<compile_context>
chip_gen: v7x
topology: tpu7x:2x2x1
jax: 0.10.0
libtpu: 0.0.40
codegen_flags: <defaults>
</compile_context>

<pallas_src>
import jax
import jax.numpy as jnp
from jax.experimental import pallas as pl
from jax.experimental.pallas import tpu as pltpu


def _mlp_softmax_kernel(x_ref, w1_ref, b1_ref, w2_ref, b2_ref, o_ref):
    # Hoist bias reads once per grid step (JAX does not CSE broadcasts).
    b1 = b1_ref[...]                      # (1, H)     f32
    b2 = b2_ref[...]                      # (1, D_out) f32

    # fc1 + ReLU : bf16 MXU operands, f32 accumulation, f32 elementwise.
    h = jnp.dot(x_ref[...], w1_ref[...], preferred_element_type=jnp.float32) + b1
    h = jnp.maximum(h, 0.0)

    # fc2 : hidden activations re-quantized to bf16 for the MXU.
    logits = jnp.dot(h.astype(jnp.bfloat16), w2_ref[...],
                     preferred_element_type=jnp.float32) + b2

    # Numerically stable softmax over the (unpadded) output dim; exact division
    # so rows sum to 1 to f32 accuracy.
    m = jnp.max(logits, axis=-1, keepdims=True)
    e = jnp.exp(logits - m)
    denom = jnp.sum(e, axis=-1, keepdims=True)
    o_ref[...] = (e / denom).astype(o_ref.dtype)


def _cdiv(a, b):
    return (a + b - 1) // b


def _round_up(n, m):
    return ((n + m - 1) // m) * m


def _select_tiling(B, tile_m):
    """Pick (TM, Bp) so that: TM <= tile_m, TM is a multiple of 8 (16 when >8,
    bf16 sublane-friendly), dead-row padding stays small, and -- when B is big
    enough -- there are >=2 tiles so v7x megacore can shard the batch axis."""
    n_tiles = max(1, _cdiv(B, tile_m))
    if B > 16 and n_tiles < 2:
        n_tiles = 2                        # engage both v7x TensorCores
    tm_raw = _cdiv(B, n_tiles)
    TM = 8 if tm_raw <= 8 else _round_up(tm_raw, 16)
    Bp = n_tiles * TM
    return TM, Bp


def network_forward(x, w1, b1, w2, b2, *, tile_m=512):
    """x: (B, D_in); w1: (D_in, H); b1: (H,); w2: (H, D_out); b2: (D_out,)."""
    B, D_in = x.shape
    H = w1.shape[1]
    D_out = w2.shape[1]

    TM, Bp = _select_tiling(B, tile_m)

    bf16 = jnp.bfloat16
    f32 = jnp.float32

    # bf16 MXU operands; cast is fused with the (batch-only) pad in the wrapper.
    xp = jnp.pad(x.astype(bf16), ((0, Bp - B), (0, 0)))
    w1b = w1.astype(bf16)
    w2b = w2.astype(bf16)
    b1f = b1.astype(f32).reshape(1, H)
    b2f = b2.astype(f32).reshape(1, D_out)

    grid = (Bp // TM,)

    flops = 2 * Bp * (D_in * H + H * D_out)
    transcendentals = Bp * D_out                            # exp in softmax
    bytes_accessed = (2 * Bp * D_in                         # x   (bf16)
                      + 2 * (D_in * H + H * D_out)          # W1, W2 (bf16)
                      + 4 * (H + D_out)                     # biases (f32)
                      + 4 * Bp * D_out)                     # output (f32)

    out = pl.pallas_call(
        _mlp_softmax_kernel,
        out_shape=jax.ShapeDtypeStruct((Bp, D_out), f32),
        grid=grid,
        in_specs=[
            pl.BlockSpec((TM, D_in), lambda i: (i, 0)),     # x tile, pipelined over batch
            pl.BlockSpec((D_in, H), lambda i: (0, 0)),      # W1 resident (full block)
            pl.BlockSpec((1, H), lambda i: (0, 0)),         # b1 resident
            pl.BlockSpec((H, D_out), lambda i: (0, 0)),     # W2 resident (full block)
            pl.BlockSpec((1, D_out), lambda i: (0, 0)),     # b2 resident
        ],
        out_specs=pl.BlockSpec((TM, D_out), lambda i: (i, 0)),
        compiler_params=pltpu.CompilerParams(
            dimension_semantics=("parallel",),              # megacore-shardable on v7x
        ),
        cost_estimate=pl.CostEstimate(
            flops=flops,
            transcendentals=transcendentals,
            bytes_accessed=bytes_accessed,
        ),
    )(xp, w1b, b1f, w2b, b2f)

    return out[:B] if Bp != B else out


def init_params(key, input_layer, hidden_layer, output_layer):
    """Deterministic init mimicking PyTorch nn.Linear (uniform +-1/sqrt(fan_in)).
    Weights are stored already transposed to (in, out) for the kernel."""
    k1, k2, k3, k4 = jax.random.split(key, 4)
    bound1 = 1.0 / (input_layer ** 0.5)
    bound2 = 1.0 / (hidden_layer ** 0.5)
    w1 = jax.random.uniform(k1, (input_layer, hidden_layer), jnp.float32, -bound1, bound1)
    b1 = jax.random.uniform(k2, (hidden_layer,), jnp.float32, -bound1, bound1)
    w2 = jax.random.uniform(k3, (hidden_layer, output_layer), jnp.float32, -bound2, bound2)
    b2 = jax.random.uniform(k4, (output_layer,), jnp.float32, -bound2, bound2)
    return w1, b1, w2, b2


if __name__ == "__main__":
    input_layer, hidden_layer, output_layer = 32, 64, 16
    batch = 8

    key = jax.random.PRNGKey(0)
    kx, kp = jax.random.split(key)
    x = jax.random.normal(kx, (batch, input_layer), jnp.float32)
    w1, b1, w2, b2 = init_params(kp, input_layer, hidden_layer, output_layer)

    out = network_forward(x, w1, b1, w2, b2)
    out = jax.block_until_ready(out)

    # Sanity check against a pure-JAX f32 reference (bf16 MXU operands => loose atol).
    h_ref = jnp.maximum(x @ w1 + b1[None, :], 0.0)
    ref = jax.nn.softmax(h_ref @ w2 + b2[None, :], axis=-1)
    assert out.shape == (batch, output_layer)
    assert jnp.allclose(out, ref, atol=2e-2, rtol=0.0), float(jnp.max(jnp.abs(out - ref)))
    assert jnp.allclose(jnp.sum(out, axis=-1), 1.0, atol=1e-3)

    print("KERNEL_OK")
</pallas_src>

<mosaic_0001>
module attributes {stable_mosaic.version = 11 : i64} {
  func.func @_mlp_softmax_kernel(%arg0: i32, %arg1: memref<8x32xbf16, #tpu.memory_space<vmem>>, %arg2: memref<32x64xbf16, #tpu.memory_space<vmem>>, %arg3: memref<1x64xf32, #tpu.memory_space<vmem>>, %arg4: memref<64x16xbf16, #tpu.memory_space<vmem>>, %arg5: memref<1x16xf32, #tpu.memory_space<vmem>>, %arg6: memref<8x16xf32, #tpu.memory_space<vmem>>) attributes {dimension_semantics = [#tpu.dimension_semantics<parallel>], iteration_bounds = array<i64: 1>, scalar_prefetch = 0 : i64, scratch_operands = 0 : i64, tpu.core_type = #tpu.core_type<tc>, window_params = [{transform_indices = @transform_0, window_bounds = array<i64: 8, 32>}, {pipeline_mode = #tpu.pipeline_mode<synchronous>, transform_indices = @transform_1, window_bounds = array<i64: 32, 64>}, {pipeline_mode = #tpu.pipeline_mode<synchronous>, transform_indices = @transform_2, window_bounds = array<i64: 1, 64>}, {pipeline_mode = #tpu.pipeline_mode<synchronous>, transform_indices = @transform_3, window_bounds = array<i64: 64, 16>}, {pipeline_mode = #tpu.pipeline_mode<synchronous>, transform_indices = @transform_4, window_bounds = array<i64: 1, 16>}, {transform_indices = @transform_5, window_bounds = array<i64: 8, 16>}]} {
    %c0 = arith.constant 0 : index
    %c0_0 = arith.constant 0 : index
    %0 = vector.load %arg3[%c0, %c0_0] : memref<1x64xf32, #tpu.memory_space<vmem>>, vector<1x64xf32>
    %c0_1 = arith.constant 0 : index
    %c0_2 = arith.constant 0 : index
    %1 = vector.load %arg5[%c0_1, %c0_2] : memref<1x16xf32, #tpu.memory_space<vmem>>, vector<1x16xf32>
    %c0_3 = arith.constant 0 : index
    %c0_4 = arith.constant 0 : index
    %2 = vector.load %arg1[%c0_3, %c0_4] : memref<8x32xbf16, #tpu.memory_space<vmem>>, vector<8x32xbf16>
    %c0_5 = arith.constant 0 : index
    %c0_6 = arith.constant 0 : index
    %3 = vector.load %arg2[%c0_5, %c0_6] : memref<32x64xbf16, #tpu.memory_space<vmem>>, vector<32x64xbf16>
    %cst = arith.constant dense<0.000000e+00> : vector<8x64xf32>
    %4 = tpu.matmul %2, %3, %cst {dimension_numbers = #tpu.dot_dimension_numbers<[1], [0], [0], [1], [0, 0, 1, 1], [], []>} : vector<8x32xbf16>, vector<32x64xbf16>, vector<8x64xf32> -> vector<8x64xf32>
    %5 = vector.broadcast %0 : vector<1x64xf32> to vector<8x64xf32>
    %6 = arith.addf %4, %5 : vector<8x64xf32>
    %cst_7 = arith.constant 0.000000e+00 : f32
    %7 = vector.broadcast %cst_7 : f32 to vector<8x64xf32>
    %8 = arith.maximumf %6, %7 : vector<8x64xf32>
    %9 = arith.truncf %8 : vector<8x64xf32> to vector<8x64xbf16>
    %c0_8 = arith.constant 0 : index
    %c0_9 = arith.constant 0 : index
    %10 = vector.load %arg4[%c0_8, %c0_9] : memref<64x16xbf16, #tpu.memory_space<vmem>>, vector<64x16xbf16>
    %cst_10 = arith.constant dense<0.000000e+00> : vector<8x16xf32>
    %11 = tpu.matmul %9, %10, %cst_10 {dimension_numbers = #tpu.dot_dimension_numbers<[1], [0], [0], [1], [0, 0, 1, 1], [], []>} : vector<8x64xbf16>, vector<64x16xbf16>, vector<8x16xf32> -> vector<8x16xf32>
    %12 = vector.broadcast %1 : vector<1x16xf32> to vector<8x16xf32>
    %13 = arith.addf %11, %12 : vector<8x16xf32>
    %cst_11 = arith.constant dense<0xFF800000> : vector<8xf32>
    %14 = vector.multi_reduction <maximumf>, %13, %cst_11 [1] : vector<8x16xf32> to vector<8xf32>
    %15 = vector.shape_cast %14 : vector<8xf32> to vector<8x1xf32>
    %16 = vector.broadcast %15 : vector<8x1xf32> to vector<8x16xf32>
    %17 = arith.subf %13, %16 : vector<8x16xf32>
    %18 = math.exp %17 : vector<8x16xf32>
    %cst_12 = arith.constant dense<0.000000e+00> : vector<8xf32>
    %19 = vector.multi_reduction <add>, %18, %cst_12 [1] : vector<8x16xf32> to vector<8xf32>
    %20 = vector.shape_cast %19 : vector<8xf32> to vector<8x1xf32>
    %21 = vector.broadcast %20 : vector<8x1xf32> to vector<8x16xf32>
    %22 = arith.divf %18, %21 : vector<8x16xf32>
    %c0_13 = arith.constant 0 : index
    %c0_14 = arith.constant 0 : index
    %23 = vector.load %arg6[%c0_13, %c0_14] : memref<8x16xf32, #tpu.memory_space<vmem>>, vector<8x16xf32>
    tpu.vector_store %arg6[%c0_13, %c0_14], %22 {strides = array<i32>} : memref<8x16xf32, #tpu.memory_space<vmem>>, vector<8x16xf32>,
    return
  }
  func.func @transform_0(%arg0: i32) -> (i32, i32) {
    %c0_i32 = arith.constant 0 : i32
    %c0_i32_0 = arith.constant 0 : i32
    return %arg0, %c0_i32 : i32, i32
  }
  func.func @transform_1(%arg0: i32) -> (i32, i32) {
    %c0_i32 = arith.constant 0 : i32
    %c0_i32_0 = arith.constant 0 : i32
    %c0_i32_1 = arith.constant 0 : i32
    return %c0_i32, %c0_i32_0 : i32, i32
  }
  func.func @transform_2(%arg0: i32) -> (i32, i32) {
    %c0_i32 = arith.constant 0 : i32
    %c0_i32_0 = arith.constant 0 : i32
    %c0_i32_1 = arith.constant 0 : i32
    return %c0_i32, %c0_i32_0 : i32, i32
  }
  func.func @transform_3(%arg0: i32) -> (i32, i32) {
    %c0_i32 = arith.constant 0 : i32
    %c0_i32_0 = arith.constant 0 : i32
    %c0_i32_1 = arith.constant 0 : i32
    return %c0_i32, %c0_i32_0 : i32, i32
  }
  func.func @transform_4(%arg0: i32) -> (i32, i32) {
    %c0_i32 = arith.constant 0 : i32
    %c0_i32_0 = arith.constant 0 : i32
    %c0_i32_1 = arith.constant 0 : i32
    return %c0_i32, %c0_i32_0 : i32, i32
  }
  func.func @transform_5(%arg0: i32) -> (i32, i32) {
    %c0_i32 = arith.constant 0 : i32
    %c0_i32_0 = arith.constant 0 : i32
    return %arg0, %c0_i32 : i32, i32
  }
}

</mosaic_0001>

<bundles_post_ra>
// kernel: tpu_custom_call.1
= control target key start
LH: loop header
LB: loop body
LE: loop exit
PB: predicated region body
PF: predicated region fallthrough
CT: control target
= control target key end

     0   :  { %v277_v1 = vmov 0.0   ;;  %vm278_vm0 = vmmov 0   ;;  %vm47_vm1 = vcmask 261120   ;;  %s352_s0 = inlined_call_operand.vmem [shape: bf16[8,32], index: 0, kind: input, shape index: {}]   ;;  %s353_s1 = inlined_call_operand.vmem [shape: bf16[32,64], index: 1, kind: input, shape index: {}]   ;;  %s354_s2 = inlined_call_operand.vmem [shape: f32[1,64], index: 2, kind: input, shape index: {}]   ;;  %s355_s3 = inlined_call_operand.vmem [shape: bf16[64,16], index: 3, kind: input, shape index: {}]   ;;  %s356_s4 = inlined_call_operand.vmem [shape: f32[1,16], index: 4, kind: input, shape index: {}]   ;;  %s357_s5 = inlined_call_operand.hbm [shape: f32[8,16], index: 5, kind: output, shape index: {}]  }
   0x1   :  { %v243_v0 = vld [vmem:[%s353_s1] sm:$0xff]   ;;  %220 = vmatprep.subr.bf16.mxu0 %v277_v1  ;;  %228 = vmatprep.subr.bf16.mxu1 %v277_v1  ;;  %v244_v2 = vld [vmem:[%s353_s1 + $0x8] sm:$0xff]  }
   0x2   :  { %221 = vmatpush3.bf16.msra.mxu0 %v243_v0  ;;  %224 = vmatprep.mubr.msk.bf16.mxu0 %vm278_vm0, %v277_v1  ;;  %v245_v3 = vld [vmem:[%s355_s3] sm:$0xff]   ;;  %v246_v4 = vld [vmem:[%s355_s3 + $0x8] sm:$0xff]  }
   0x3   :  { %222 = vmatprep.subr.bf16.mxu0 %v277_v1  ;;  %236 = vmatprep.mubr.msk.bf16.mxu1 %vm278_vm0, %v277_v1  ;;  %v24_v5 = vld [vmem:[%s352_s0] sm:$0xf] }
   0x4   :  { %229 = vmatpush3.bf16.msra.mxu1 %v245_v3 }
   0x5   :  { %230 = vmatprep.subr.bf16.mxu1 %v277_v1 }
   0x6   :  { %223 = vmatpush3.bf16.msra.mxu0 %v244_v2 }
   0x7   :  { %10 = vsyncpa [#allocation3], 0  ;;  %v247_v6 = vld [vmem:[%s355_s3 + $0x10] sm:$0xff]   ;;  %v248_v7 = vld [vmem:[%s355_s3 + $0x18] sm:$0xff]   ;;  %vm131_vm2 = vcmask 523264   ;;  %vm175_vm3 = vcmask 130048  }
   0x8   :  { %231 = vmatpush3.bf16.msra.mxu1 %v246_v4  ;;  %v202_v8 = vld [vmem:[%s354_s2] ss:$0 sm:$0xff]  ;;  %s279_s2 = smov [#allocation2]  }
   0x9   :  { %225 = vmatmul.mubr.msk.bf16.vlgmr.msra.gmra.mrb[0].mxu0 %vm47_vm1, %v24_v5  ;;  %232 = vmatprep.subr.bf16.mxu1 %v277_v1  ;;  %v206_v16 = vld [vmem:[%s356_s4] ss:$0 sm:$0xff]  ;;  %s194_s3 = sshll.u32 %s279_s2, 4  ;;  %s195_s3 = int_to_ptr.vmem [resolvable:$true] %s194_s3 }
   0xa   :  { %s253_s4 = scalar_lea.vmem %s195_s3, 128  ;;  %p258_p1 = scmp.lt.s32.totalorder %s195_s3, %s195_s3 }
   0xb   :  { %p254_p0 = scmp.ne.s32.totalorder %s195_s3, %s253_s4  ;;  %p259_p2 = scmp.lt.s32.totalorder %s253_s4, %s253_s4 }
   0xc   :  { %233 = vmatpush3.bf16.msra.mxu1 %v247_v6 }
   0xd   :  { %234 = vmatprep.subr.bf16.mxu1 %v277_v1  ;;  %p260_p3 = por %p259_p2, %p258_p1 }
   0xf   :  { %p261_p4 = pnand %p260_p3, %p254_p0 }
  0x10   :  { %235 = vmatpush3.bf16.msra.mxu1 %v248_v7 }
  0xdc   :  { %v85_v9 = vpop.f32.mrb[0].mxu0 }
  0xdd   :  { %v86_v10 = vadd.f32 %v202_v8, %v85_v9  ;;  %v226_v11 = vpop.f32.mrb[1].mxu0 }
  0xde   :  { %v88_v12 = vpop.f32.mrb[2].mxu0 }
  0xdf   :  { %v91_v13 = vmax.f32 %v86_v10, 0.0  ;;  %v227_v14 = vpop.f32.mrb[3].mxu0 }
  0xe1   :  { %v92_v15 = vpack.c.bf16 %v91_v13, %v91_v13 }
  0xe3   :  { %237 = vmatmul.mubr.msk.bf16.vlgmr.msra.gmra.mrb[0].mxu1 %vm131_vm2, %v92_v15 }
 0x1b6   :  { %v169_v17 = vpop.f32.mrb[0].mxu1 }
 0x1b7   :  { %v170_v18 = vadd.f32 %v206_v16, %v169_v17  ;;  %v238_v19 = vpop.f32.mrb[1].mxu1 }
 0x1b8   :  { %v172_v20 = vpop.f32.mrb[2].mxu1 }
 0x1b9   :  { %v239_v21 = vpop.f32.mrb[3].mxu1  ;;  %v176_v22 = vsel %vm175_vm3, %v170_v18, -inf }
 0x1ba   :  { %177 = vmax.xlane.f32.xlu0 %v176_v22 }
 0x247   :  { %v178_v23 = vpop.xlane.xlu0 %177 }
 0x248   :  { %v179_v24 = vsub.f32 %v170_v18, %v178_v23 }
 0x24a   :  { %v180_v25 = vmul.f32 1.442695, %v179_v24 }
 0x24c   :  { %249 = vpow2.f32 %v180_v25 }
 0x256   :  { %v250_v26 = vpop.eup %249 }
 0x257   :  { %v182_v27 = vsel %vm175_vm3, %v250_v26, 0.0 }
 0x258   :  { %183 = vadd.xlane.f32.xlu0 %v182_v27 }
 0x2e5   :  { %v184_v28 = vpop.xlane.xlu0 %183 }
 0x2e6   :  { %251 = vrcp.f32 %v184_v28 }
 0x2f0   :  { %v252_v29 = vpop.eup %251 }
 0x2f1   :  { %v186_v30 = vmul.f32 %v252_v29, %v250_v26 }
 0x2f3   :  { %187 = vst.msk [vmem:[#allocation2] sm:$0xff] %vm175_vm3, %v186_v30 }
 0x2f4   :  { %264 = shalt.err (!%p261_p4)
}
 0x2f5   :  { %s265_s11 = scalar_lea.hbm %s357_s5, 128 }
 0x2f6   :  { %p266_p5 = scmp.ne.s32.totalorder %s357_s5, %s265_s11  ;;  %p269_p6 = scmp.lt.u32.totalorder %s265_s11, %s357_s5 }
 0x2f8   :  { %p271_p7 = pnand %p269_p6, %p266_p5 }
 0x2fa   :  { %274 = shalt.err (!%p271_p7)
}
 0x2fb   :  { %197 = dma.vmem_to_hbm [thread:$0]  %s195_s3, 128, %s357_s5, [#allocation3]  }
 0x2fc   :  { %275 = dma.done.wait [#allocation3], 128  }
 0x2fd   :  { %276 = vsyncadd [#allocation3], 4294967168 }
 0x2fe   :  { %201 = vsyncpa [#allocation3], 1 }

</bundles_post_ra>
